<compile_context>
chip_gen: v7x
topology: tpu7x:2x2x1
jax: 0.10.0
libtpu: 0.0.40
codegen_flags: <defaults>
</compile_context>

<pallas_src>
import jax
import jax.numpy as jnp
from jax import lax
from jax.experimental import pallas as pl
from jax.experimental.pallas import tpu as pltpu

LANES = 128
SUBLANES = 8
ALIGN = SUBLANES * LANES                 # 1024 elements -> rows always % 8 == 0
TARGET_BLOCK_BYTES = 2 * 1024 * 1024     # ~2 MiB per input block per grid step
NUM_CORES = 2                            # v7x megacore split; harmless on 1-TC chips


def _make_mae_kernel(rows, tile_rows, steps_per_core, full_blocks, total_blocks):
    """Sum of |o - t| accumulated into a per-core (1, 8, 128) f32 output block."""
    need_mask = total_blocks > full_blocks   # ragged last block and/or phantom blocks

    def _partial(diff):
        # (tile_rows,128) -> (tile_rows//8, 8, 128) regroups whole (8,128) tiles
        # (no relayout); sum(axis=0) is cross-vreg VPU adds only (no XLU).
        return diff.reshape(-1, SUBLANES, LANES).sum(axis=0)[None]

    def kernel(o_ref, t_ref, out_ref):
        c = pl.program_id(0)
        i = pl.program_id(1)
        b = c * steps_per_core + i           # logical (unclamped) block index

        @pl.when(i == 0)
        def _init():
            out_ref[...] = jnp.zeros_like(out_ref)

        diff = jnp.abs(
            o_ref[...].astype(jnp.float32) - t_ref[...].astype(jnp.float32)
        )

        if not need_mask:
            out_ref[...] += _partial(diff)
        else:
            @pl.when(b < full_blocks)
            def _full_block():
                out_ref[...] += _partial(diff)

            @pl.when(b >= full_blocks)
            def _masked_block():
                # Rows at/after `rows` are stale VMEM (ragged last block) or a
                # clamped re-fetch (phantom step on core 1) -- zero them out.
                grow = b * tile_rows + lax.broadcasted_iota(
                    jnp.int32, (tile_rows, LANES), 0
                )
                out_ref[...] += _partial(jnp.where(grow < rows, diff, 0.0))

    return kernel


def age_loss(outputs, targets, *, target_block_bytes=TARGET_BLOCK_BYTES):
    """Pallas equivalent of torch.abs(outputs - targets).mean()."""
    assert outputs.shape == targets.shape, "outputs/targets must match"
    n = outputs.size
    if n == 0:
        return jnp.float32(jnp.nan)          # torch .mean() of an empty tensor

    o = outputs.reshape(-1)                  # free for contiguous arrays
    t = targets.reshape(-1)

    # Alignment pad only when needed (<=1023 zeros; |0-0| contributes 0).
    # allow_input_fusion below lets XLA fuse this pad into the kernel's input
    # reads so unaligned n does not cost a separate full-array HBM pass.
    pad = (-n) % ALIGN
    if pad:
        o = jnp.pad(o, (0, pad))
        t = jnp.pad(t, (0, pad))

    rows = (n + pad) // LANES                # multiple of 8
    o2 = o.reshape(rows, LANES)
    t2 = t.reshape(rows, LANES)

    # ~2 MiB per input block, dtype aware; always a multiple of 8 rows.
    itemsize = jnp.dtype(outputs.dtype).itemsize
    max_tile_rows = max(
        SUBLANES,
        (target_block_bytes // (LANES * itemsize)) // SUBLANES * SUBLANES,
    )
    tile_rows = min(max_tile_rows, rows)

    steps = pl.cdiv(rows, tile_rows)
    cores = NUM_CORES if steps >= 2 else 1
    steps_per_core = pl.cdiv(steps, cores)
    total_blocks = cores * steps_per_core
    full_blocks = rows // tile_rows          # blocks with no out-of-range rows

    kernel = _make_mae_kernel(
        rows, tile_rows, steps_per_core, full_blocks, total_blocks
    )

    def in_map(c, i):
        # Clamp phantom steps (only when `steps` is odd) to a valid block; the
        # in-kernel mask zeroes their contribution.
        return (jnp.minimum(c * steps_per_core + i, steps - 1), 0)

    partials = pl.pallas_call(
        kernel,
        out_shape=jax.ShapeDtypeStruct((cores, SUBLANES, LANES), jnp.float32),
        grid_spec=pltpu.PrefetchScalarGridSpec(
            num_scalar_prefetch=0,
            grid=(cores, steps_per_core),
            in_specs=[
                pl.BlockSpec((tile_rows, LANES), in_map),
                pl.BlockSpec((tile_rows, LANES), in_map),
            ],
            out_specs=pl.BlockSpec((1, SUBLANES, LANES), lambda c, i: (c, 0, 0)),
        ),
        compiler_params=pltpu.CompilerParams(
            dimension_semantics=("parallel", "arbitrary"),
            allow_input_fusion=[True, True],
            vmem_limit_bytes=32 * 1024 * 1024,
        ),
    )(o2, t2)

    # Tiny (cores*8*128 element) final reduce + mean in plain JAX.
    return jnp.sum(partials) / jnp.float32(n)


if __name__ == "__main__":
    key = jax.random.PRNGKey(0)

    def check(shape, *, target_block_bytes=TARGET_BLOCK_BYTES, seed=0):
        k1, k2 = jax.random.split(jax.random.fold_in(key, seed))
        outputs = jax.random.uniform(k1, shape, jnp.float32) * 100.0
        targets = jax.random.uniform(k2, shape, jnp.float32) * 100.0
        loss = jax.block_until_ready(
            age_loss(outputs, targets, target_block_bytes=target_block_bytes)
        )
        ref = jnp.mean(jnp.abs(outputs - targets))
        assert jnp.allclose(loss, ref, rtol=1e-4, atol=1e-4), (shape, loss, ref)

    # Typical AgeLoss inputs: per-sample age predictions vs. targets.
    check((16, 1), seed=0)                                # tiny batch, pad path
    check((2048, 1), seed=1)                              # aligned, single block
    # Small-tile run exercising multi-block grid, the 2-core split,
    # the ragged-block mask and a phantom (clamped) block.
    check((333_000,), target_block_bytes=64 * 1024, seed=2)

    print("KERNEL_OK")
</pallas_src>

<mosaic_0001>
module attributes {stable_mosaic.version = 11 : i64} {
  func.func @kernel(%arg0: i32, %arg1: i32, %arg2: memref<8x128xf32, #tpu.memory_space<vmem>>, %arg3: memref<8x128xf32, #tpu.memory_space<vmem>>, %arg4: memref<1x8x128xf32, #tpu.memory_space<vmem>>) attributes {dimension_semantics = [#tpu.dimension_semantics<parallel>, #tpu.dimension_semantics<arbitrary>], iteration_bounds = array<i64: 1, 1>, scalar_prefetch = 0 : i64, scratch_operands = 0 : i64, tpu.core_type = #tpu.core_type<tc>, window_params = [{transform_indices = @transform_0, window_bounds = array<i64: 8, 128>}, {transform_indices = @transform_1, window_bounds = array<i64: 8, 128>}, {transform_indices = @transform_2, window_bounds = array<i64: 1, 8, 128>}]} {
    %c0_i32 = arith.constant 0 : i32
    %0 = arith.cmpi eq, %arg1, %c0_i32 : i32
    %1 = arith.extui %0 : i1 to i32
    %c0_i32_0 = arith.constant 0 : i32
    %2 = arith.cmpi ne, %1, %c0_i32_0 : i32
    scf.if %2 {
      %cst_10 = arith.constant 0.000000e+00 : f32
      %13 = vector.broadcast %cst_10 : f32 to vector<1x8x128xf32>
      %c0_11 = arith.constant 0 : index
      %c0_12 = arith.constant 0 : index
      %c0_13 = arith.constant 0 : index
      %14 = vector.load %arg4[%c0_11, %c0_12, %c0_13] : memref<1x8x128xf32, #tpu.memory_space<vmem>>, vector<1x8x128xf32>
      tpu.vector_store %arg4[%c0_11, %c0_12, %c0_13], %13 {strides = array<i32>} : memref<1x8x128xf32, #tpu.memory_space<vmem>>, vector<1x8x128xf32>,
    } else {
    }
    %c0 = arith.constant 0 : index
    %c0_1 = arith.constant 0 : index
    %3 = vector.load %arg2[%c0, %c0_1] : memref<8x128xf32, #tpu.memory_space<vmem>>, vector<8x128xf32>
    %c0_2 = arith.constant 0 : index
    %c0_3 = arith.constant 0 : index
    %4 = vector.load %arg3[%c0_2, %c0_3] : memref<8x128xf32, #tpu.memory_space<vmem>>, vector<8x128xf32>
    %5 = arith.subf %3, %4 : vector<8x128xf32>
    %6 = math.absf %5 : vector<8x128xf32>
    %c0_4 = arith.constant 0 : index
    %c0_5 = arith.constant 0 : index
    %c0_6 = arith.constant 0 : index
    %7 = vector.load %arg4[%c0_4, %c0_5, %c0_6] : memref<1x8x128xf32, #tpu.memory_space<vmem>>, vector<1x8x128xf32>
    %8 = vector.shape_cast %6 : vector<8x128xf32> to vector<1x8x128xf32>
    %cst = arith.constant dense<0.000000e+00> : vector<8x128xf32>
    %9 = vector.multi_reduction <add>, %8, %cst [0] : vector<1x8x128xf32> to vector<8x128xf32>
    %10 = vector.shape_cast %9 : vector<8x128xf32> to vector<1x8x128xf32>
    %11 = arith.addf %7, %10 : vector<1x8x128xf32>
    %c0_7 = arith.constant 0 : index
    %c0_8 = arith.constant 0 : index
    %c0_9 = arith.constant 0 : index
    %12 = vector.load %arg4[%c0_7, %c0_8, %c0_9] : memref<1x8x128xf32, #tpu.memory_space<vmem>>, vector<1x8x128xf32>
    tpu.vector_store %arg4[%c0_7, %c0_8, %c0_9], %11 {strides = array<i32>} : memref<1x8x128xf32, #tpu.memory_space<vmem>>, vector<1x8x128xf32>,
    return
  }
  func.func @transform_0(%arg0: i32, %arg1: i32) -> (i32, i32) {
    %c1_i32 = arith.constant 1 : i32
    %0 = arith.muli %arg0, %c1_i32 : i32
    %1 = arith.addi %0, %arg1 : i32
    %c0_i32 = arith.constant 0 : i32
    %2 = arith.minsi %1, %c0_i32 : i32
    %c0_i32_0 = arith.constant 0 : i32
    %c0_i32_1 = arith.constant 0 : i32
    return %2, %c0_i32_0 : i32, i32
  }
  func.func @transform_1(%arg0: i32, %arg1: i32) -> (i32, i32) {
    %c1_i32 = arith.constant 1 : i32
    %0 = arith.muli %arg0, %c1_i32 : i32
    %1 = arith.addi %0, %arg1 : i32
    %c0_i32 = arith.constant 0 : i32
    %2 = arith.minsi %1, %c0_i32 : i32
    %c0_i32_0 = arith.constant 0 : i32
    %c0_i32_1 = arith.constant 0 : i32
    return %2, %c0_i32_0 : i32, i32
  }
  func.func @transform_2(%arg0: i32, %arg1: i32) -> (i32, i32, i32) {
    %c0_i32 = arith.constant 0 : i32
    %c0_i32_0 = arith.constant 0 : i32
    %c0_i32_1 = arith.constant 0 : i32
    return %arg0, %c0_i32, %c0_i32_0 : i32, i32, i32
  }
}

</mosaic_0001>

<bundles_post_ra>
// kernel: tpu_custom_call.1
= control target key start
LH: loop header
LB: loop body
LE: loop exit
PB: predicated region body
PF: predicated region fallthrough
CT: control target
= control target key end

     0   :  { %7 = vsyncpa [#allocation3], 0  ;;  %s215_s0 = inlined_call_operand.hbm [shape: f32[8,128], index: 0, kind: input, shape index: {}]   ;;  %s216_s1 = inlined_call_operand.hbm [shape: f32[8,128], index: 1, kind: input, shape index: {}]   ;;  %s217_s2 = inlined_call_operand.hbm [shape: f32[1,8,128], index: 2, kind: output, shape index: {}]  }
   0x1   :  { %8 = vsyncpa [#allocation6], 0 }
   0x2   :  { %9 = vsyncpa [#allocation4], 0  ;;  %s161_s9 = smov [#allocation2]   ;;  %s162_s11 = smov [#allocation5]  }
   0x3   :  { %s21_s10 = sshll.u32 %s161_s9, 4  ;;  %s36_s12 = sshll.u32 %s162_s11, 4  ;;  %s22_s10 = int_to_ptr.vmem [resolvable:$true] %s21_s10  ;;  %s37_s12 = int_to_ptr.vmem [resolvable:$true] %s36_s12 }
   0x4   :  { %s89_s15 = scalar_lea.hbm %s215_s0, 128 }
   0x5   :  { %p90_p0 = scmp.ne.s32.totalorder %s215_s0, %s89_s15  ;;  %p93_p1 = scmp.lt.u32.totalorder %s89_s15, %s215_s0 }
   0x7   :  { %p95_p2 = pnand %p93_p1, %p90_p0 }
   0x9   :  { %98 = shalt.err (!%p95_p2)
}
   0xa   :  { %s99_s20 = scalar_lea.vmem %s22_s10, 128  ;;  %p104_p4 = scmp.lt.s32.totalorder %s22_s10, %s22_s10 }
   0xb   :  { %p100_p3 = scmp.ne.s32.totalorder %s22_s10, %s99_s20  ;;  %p105_p5 = scmp.lt.s32.totalorder %s99_s20, %s99_s20 }
   0xd   :  { %p106_p6 = por %p105_p5, %p104_p4 }
   0xf   :  { %p107_p7 = pnand %p106_p6, %p100_p3 }
  0x11   :  { %110 = shalt.err (!%p107_p7)
}
  0x12   :  { %24 = dma.hbm_to_vmem [thread:$0]  %s215_s0, 128, %s22_s10, [#allocation3]  }
  0x13   :  { %s111_s25 = scalar_lea.hbm %s216_s1, 128 }
  0x14   :  { %p112_p8 = scmp.ne.s32.totalorder %s216_s1, %s111_s25  ;;  %p115_p9 = scmp.lt.u32.totalorder %s111_s25, %s216_s1 }
  0x16   :  { %p117_p10 = pnand %p115_p9, %p112_p8 }
  0x18   :  { %120 = shalt.err (!%p117_p10)
}
  0x19   :  { %s121_s30 = scalar_lea.vmem %s37_s12, 128  ;;  %p126_p12 = scmp.lt.s32.totalorder %s37_s12, %s37_s12 }
  0x1a   :  { %p122_p11 = scmp.ne.s32.totalorder %s37_s12, %s121_s30  ;;  %p127_p13 = scmp.lt.s32.totalorder %s121_s30, %s121_s30 }
  0x1c   :  { %p128_p0 = por %p127_p13, %p126_p12 }
  0x1e   :  { %p129_p1 = pnand %p128_p0, %p122_p11 }
  0x20   :  { %132 = shalt.err (!%p129_p1)
}
  0x21   :  { %39 = dma.hbm_to_vmem [thread:$0]  %s216_s1, 128, %s37_s12, [#allocation6]  }
  0x22   :  { %155 = dma.done.wait [#allocation3], 128  }
  0x23   :  { %156 = vsyncadd [#allocation3], 4294967168 }
  0x24   :  { %157 = dma.done.wait [#allocation6], 128  }
  0x25   :  { %158 = vsyncadd [#allocation6], 4294967168  ;;  %v57_v0 = vld [vmem:[#allocation2] sm:$0xff]  ;;  %v58_v1 = vld [vmem:[#allocation5] sm:$0xff]  ;;  %s163_s4 = smov [#allocation7]  }
  0x26   :  { %v59_v2 = vsub.f32 %v57_v0, %v58_v1  ;;  %s71_s5 = sshll.u32 %s163_s4, 4  ;;  %s72_s5 = int_to_ptr.vmem [resolvable:$true] %s71_s5 }
  0x27   :  { %s133_s6 = scalar_lea.vmem %s72_s5, 128  ;;  %p138_p3 = scmp.lt.s32.totalorder %s72_s5, %s72_s5 }
  0x28   :  { %v60_v3 = vand.u32 2147483647, %v59_v2  ;;  %p134_p2 = scmp.ne.s32.totalorder %s72_s5, %s133_s6  ;;  %p139_p4 = scmp.lt.s32.totalorder %s133_s6, %s133_s6 }
  0x2a   :  { %64 = vst [vmem:[#allocation7] sm:$0xff] %v60_v3  ;;  %p140_p5 = por %p139_p4, %p138_p3 }
  0x2c   :  { %p141_p6 = pnand %p140_p5, %p134_p2 }
  0x2e   :  { %144 = shalt.err (!%p141_p6)
}
  0x2f   :  { %s145_s8 = scalar_lea.hbm %s217_s2, 128 }
  0x30   :  { %p146_p7 = scmp.ne.s32.totalorder %s217_s2, %s145_s8  ;;  %p149_p8 = scmp.lt.u32.totalorder %s145_s8, %s217_s2 }
  0x32   :  { %p151_p9 = pnand %p149_p8, %p146_p7 }
  0x34   :  { %154 = shalt.err (!%p151_p9)
}
  0x35   :  { %74 = dma.vmem_to_hbm [thread:$0]  %s72_s5, 128, %s217_s2, [#allocation4]  }
  0x36   :  { %159 = dma.done.wait [#allocation4], 128  }
  0x37   :  { %160 = vsyncadd [#allocation4], 4294967168 }
  0x38   :  { %78 = vsyncpa [#allocation3], 1 }
  0x39   :  { %79 = vsyncpa [#allocation6], 1 }
  0x3a   :  { %80 = vsyncpa [#allocation4], 1 }

</bundles_post_ra>
